<compile_context>
chip_gen: v6e
topology: v6e:2x2x1
jax: 0.10.0
libtpu: 0.0.40
codegen_flags: <defaults>
</compile_context>

<pallas_src>
import numpy as np
import jax
import jax.numpy as jnp
from jax.experimental import pallas as pl
from jax.experimental.pallas import tpu as pltpu


# ----------------------------------------------------------------------------
# Parameter setup (mirrors AnchorLayer.generate_anchors / __init__), plain numpy
# ----------------------------------------------------------------------------
def generate_anchors(box_size, ratios, scales):
    ratios = np.asarray(ratios, dtype=np.float64)
    scales = np.asarray(scales, dtype=np.float64)
    anchors = box_size * np.tile(scales, (2, len(ratios))).T        # (A, 2)
    areas = anchors[:, 0] * anchors[:, 1]
    anchors[:, 0] = np.sqrt(areas * np.repeat(ratios, len(scales)))
    anchors[:, 1] = anchors[:, 0] / np.repeat(ratios, len(scales))
    return anchors.astype(np.float32)                               # (A, 2)


# ----------------------------------------------------------------------------
# Pallas kernel: fills a (TH, W*A*4) tile of the final (H, W*A*4) anchor slab.
# Lane layout along the last axis:  for w in range(W): for a in range(A):
#     [cx(w), cy(h), width_a, height_a]
# ----------------------------------------------------------------------------
def _make_anchor_kernel(a4):
    """a4 = 4 * num_anchors (static)."""
    a4_f = float(a4)

    def kernel(stride_ref, wh_row_ref, out_ref):
        # stride_ref: SMEM (1,) f32
        # wh_row_ref: VMEM (1, W*A*4) f32 — tiled [0, 0, w_a, h_a] pattern
        # out_ref:    VMEM (TH, W*A*4) f32
        th, L = out_ref.shape
        stride = stride_ref[0]

        lane = jax.lax.broadcasted_iota(jnp.int32, (th, L), 1)
        row = jax.lax.broadcasted_iota(jnp.int32, (th, L), 0) + pl.program_id(0) * th

        c = lane & 3                                              # coord index 0..3
        # grid column index w = lane // (4*A); exact via f32 division for the
        # relevant range (lane < 2^18 << 2^24).
        wcol = jnp.floor(lane.astype(jnp.float32) / a4_f)

        cx = (wcol + 0.5) * stride
        cy = (row.astype(jnp.float32) + 0.5) * stride
        wh = jnp.broadcast_to(wh_row_ref[...], (th, L))

        # Single lane-dense slab store.
        out_ref[...] = jnp.where(c == 0, cx, jnp.where(c == 1, cy, wh))

    return kernel


# ----------------------------------------------------------------------------
# Wrapper that mimics AnchorLayer.forward(x, stride)
# ----------------------------------------------------------------------------
class AnchorLayer:
    def __init__(self, box_size=32, ratios=(1.0,), scales=(1.0,),
                 max_tile_bytes=2 << 20):
        self.num_anchors = len(scales) * len(ratios)
        box = generate_anchors(box_size, list(ratios), list(scales))   # (A, 2)
        # buffer equivalent to self.box_sizes (flattened (A, 2) -> (2*A,))
        self.box_sizes = jnp.asarray(box.reshape(-1))
        # per-anchor interleaved pattern [0, 0, w_a, h_a]  -> shape (1, 4*A)
        pat = np.zeros((self.num_anchors, 4), dtype=np.float32)
        pat[:, 2:] = box
        self._wh_pattern = jnp.asarray(pat.reshape(1, -1))
        self._max_tile_bytes = int(max_tile_bytes)
        self._cache = {}   # (H, W, stride) -> anchors, mirrors PyTorch caching

    def _pick_row_tile(self, H, row_bytes):
        """Largest multiple-of-8 divisor of H with tile <= max_tile_bytes,
        else the full H (always a legal block shape)."""
        budget_rows = max(1, self._max_tile_bytes // max(row_bytes, 1))
        best = None
        for th in range(8, min(H, budget_rows) + 1, 8):
            if H % th == 0:
                best = th
        return best if best is not None else H

    def __call__(self, x, stride):
        H, W = int(x.shape[-2]), int(x.shape[-1])
        A = self.num_anchors
        key = (H, W, float(stride))
        if key in self._cache:
            return self._cache[key]

        L = W * A * 4                      # lane-dense last dim
        th = self._pick_row_tile(H, L * 4)
        grid = (H // th,)

        out = pl.pallas_call(
            _make_anchor_kernel(4 * A),
            out_shape=jax.ShapeDtypeStruct((H, L), jnp.float32),
            grid=grid,
            in_specs=[
                pl.BlockSpec(memory_space=pltpu.MemorySpace.SMEM),   # stride
                pl.BlockSpec((1, L), lambda i: (0, 0)),              # wh row pattern
            ],
            out_specs=pl.BlockSpec((th, L), lambda i: (i, 0)),
            compiler_params=pltpu.CompilerParams(
                dimension_semantics=("parallel",)),
            cost_estimate=pl.CostEstimate(
                flops=0, transcendentals=0, bytes_accessed=H * L * 4),
        )(
            jnp.asarray([stride], dtype=jnp.float32),
            jnp.tile(self._wh_pattern, (1, W)),
        )

        anchors = out.reshape(-1, 4)       # free row-major reshape, no transpose
        self._cache[key] = anchors
        return anchors


# ----------------------------------------------------------------------------
# Reference (pure numpy) of the PyTorch forward, for verification
# ----------------------------------------------------------------------------
def _reference_anchors(H, W, A, stride, box_sizes_flat):
    ys = (np.arange(H, dtype=np.float32) + 0.5) * stride
    xs = (np.arange(W, dtype=np.float32) + 0.5) * stride
    gx = np.broadcast_to(xs[None, :, None], (H, W, A))
    gy = np.broadcast_to(ys[:, None, None], (H, W, A))
    wh = np.broadcast_to(
        np.asarray(box_sizes_flat, dtype=np.float32).reshape(1, 1, A, 2), (H, W, A, 2)
    )
    ref = np.concatenate([gx[..., None], gy[..., None], wh], axis=-1)
    return ref.reshape(-1, 4)


if __name__ == "__main__":
    key = jax.random.PRNGKey(0)

    # Small shapes consistent with the module: NCHW feature map.
    B, C, H, W = 2, 4, 16, 16
    x = jax.random.normal(key, (B, C, H, W), dtype=jnp.float32)
    stride = 8.0

    layer = AnchorLayer(box_size=32, ratios=(1.0, 2.0), scales=(1.0, 1.5))
    anchors = jax.block_until_ready(layer(x, stride))

    ref = _reference_anchors(H, W, layer.num_anchors, stride,
                             np.asarray(layer.box_sizes))
    assert anchors.shape == (H * W * layer.num_anchors, 4), anchors.shape
    assert np.allclose(np.asarray(anchors), ref, rtol=1e-6, atol=1e-5), \
        "mismatch vs reference (single-tile case)"

    # Second check: force a multi-tile grid over rows (grid=(8,), 8 rows/tile)
    # to exercise the program_id-based row offsets and the parallel pipeline.
    H2, W2, stride2 = 64, 16, 16.0
    x2 = jax.random.normal(key, (1, 1, H2, W2), dtype=jnp.float32)
    layer2 = AnchorLayer(box_size=32, ratios=(1.0, 2.0), scales=(1.0, 1.5),
                         max_tile_bytes=8 * 1024)
    anchors2 = jax.block_until_ready(layer2(x2, stride2))
    ref2 = _reference_anchors(H2, W2, layer2.num_anchors, stride2,
                              np.asarray(layer2.box_sizes))
    assert anchors2.shape == (H2 * W2 * layer2.num_anchors, 4), anchors2.shape
    assert np.allclose(np.asarray(anchors2), ref2, rtol=1e-6, atol=1e-5), \
        "mismatch vs reference (multi-tile case)"

    print("KERNEL_OK")
</pallas_src>

<mosaic_0001>
module attributes {stable_mosaic.version = 11 : i64} {
  func.func @kernel(%arg0: i32, %arg1: memref<1xf32, #tpu.memory_space<smem>>, %arg2: memref<1x256xf32, #tpu.memory_space<vmem>>, %arg3: memref<16x256xf32, #tpu.memory_space<vmem>>) attributes {dimension_semantics = [#tpu.dimension_semantics<parallel>], iteration_bounds = array<i64: 1>, scalar_prefetch = 0 : i64, scratch_operands = 0 : i64, tpu.core_type = #tpu.core_type<tc>, window_params = [{transform_indices = @transform_0, window_bounds = array<i64: 1>}, {pipeline_mode = #tpu.pipeline_mode<synchronous>, transform_indices = @transform_1, window_bounds = array<i64: 1, 256>}, {transform_indices = @transform_2, window_bounds = array<i64: 16, 256>}]} {
    %c0 = arith.constant 0 : index
    %0 = memref.load %arg1[%c0] : memref<1xf32, #tpu.memory_space<smem>>
    %1 = tpu.iota {dimensions = array<i32: 1>} : vector<16x256xi32>
    %2 = tpu.iota {dimensions = array<i32: 0>} : vector<16x256xi32>
    %c16_i32 = arith.constant 16 : i32
    %3 = arith.muli %arg0, %c16_i32 : i32
    %4 = vector.broadcast %3 : i32 to vector<16x256xi32>
    %5 = arith.addi %2, %4 : vector<16x256xi32>
    %c3_i32 = arith.constant 3 : i32
    %6 = vector.broadcast %c3_i32 : i32 to vector<16x256xi32>
    %7 = arith.andi %1, %6 : vector<16x256xi32>
    %8 = arith.sitofp %1 : vector<16x256xi32> to vector<16x256xf32>
    %cst = arith.constant 1.600000e+01 : f32
    %9 = vector.broadcast %cst : f32 to vector<16x256xf32>
    %10 = arith.divf %8, %9 : vector<16x256xf32>
    %11 = math.floor %10 : vector<16x256xf32>
    %cst_0 = arith.constant 5.000000e-01 : f32
    %12 = vector.broadcast %cst_0 : f32 to vector<16x256xf32>
    %13 = arith.addf %11, %12 : vector<16x256xf32>
    %14 = vector.broadcast %0 : f32 to vector<16x256xf32>
    %15 = arith.mulf %13, %14 : vector<16x256xf32>
    %16 = arith.sitofp %5 : vector<16x256xi32> to vector<16x256xf32>
    %cst_1 = arith.constant 5.000000e-01 : f32
    %17 = vector.broadcast %cst_1 : f32 to vector<16x256xf32>
    %18 = arith.addf %16, %17 : vector<16x256xf32>
    %19 = vector.broadcast %0 : f32 to vector<16x256xf32>
    %20 = arith.mulf %18, %19 : vector<16x256xf32>
    %c0_2 = arith.constant 0 : index
    %c0_3 = arith.constant 0 : index
    %21 = vector.load %arg2[%c0_2, %c0_3] : memref<1x256xf32, #tpu.memory_space<vmem>>, vector<1x256xf32>
    %22 = vector.shape_cast %21 : vector<1x256xf32> to vector<1x256xf32>
    %23 = vector.broadcast %22 : vector<1x256xf32> to vector<16x256xf32>
    %c0_i32 = arith.constant 0 : i32
    %24 = vector.broadcast %c0_i32 : i32 to vector<16x256xi32>
    %25 = arith.cmpi eq, %7, %24 : vector<16x256xi32>
    %c1_i32 = arith.constant 1 : i32
    %26 = vector.broadcast %c1_i32 : i32 to vector<16x256xi32>
    %27 = arith.cmpi eq, %7, %26 : vector<16x256xi32>
    %28 = arith.select %27, %20, %23 : vector<16x256xi1>, vector<16x256xf32>
    %29 = arith.select %25, %15, %28 : vector<16x256xi1>, vector<16x256xf32>
    %c0_4 = arith.constant 0 : index
    %c0_5 = arith.constant 0 : index
    %30 = vector.load %arg3[%c0_4, %c0_5] : memref<16x256xf32, #tpu.memory_space<vmem>>, vector<16x256xf32>
    tpu.vector_store %arg3[%c0_4, %c0_5], %29 {strides = array<i32>} : memref<16x256xf32, #tpu.memory_space<vmem>>, vector<16x256xf32>,
    return
  }
  func.func @transform_0(%arg0: i32) -> i32 {
    %c0_i32 = arith.constant 0 : i32
    %c0_i32_0 = arith.constant 0 : i32
    return %c0_i32 : i32
  }
  func.func @transform_1(%arg0: i32) -> (i32, i32) {
    %c0_i32 = arith.constant 0 : i32
    %c0_i32_0 = arith.constant 0 : i32
    %c0_i32_1 = arith.constant 0 : i32
    return %c0_i32, %c0_i32_0 : i32, i32
  }
  func.func @transform_2(%arg0: i32) -> (i32, i32) {
    %c0_i32 = arith.constant 0 : i32
    %c0_i32_0 = arith.constant 0 : i32
    return %arg0, %c0_i32 : i32, i32
  }
}

</mosaic_0001>

<bundles_post_ra>
// kernel: tpu_custom_call.1
= control target key start
LH: loop header
LB: loop body
LE: loop exit
PB: predicated region body
PF: predicated region fallthrough
CT: control target
= control target key end

     0   :  { %v14_v0 = vlaneseq  ;;  %s164_s0 = inlined_call_operand.<no memory space> [shape: f32[1], index: 0, kind: input, shape index: {}]   ;;  %s165_s1 = inlined_call_operand.vmem [shape: f32[1,256], index: 1, kind: input, shape index: {}]   ;;  %s166_s2 = inlined_call_operand.hbm [shape: f32[16,256], index: 2, kind: output, shape index: {}]  }
   0x1   :  { %8 = vsyncpa [#allocation4], 0  ;;  %v44_v6 = vld [vmem:[%s165_s1] sm:$0x3]  ;;  %v35_v8 = vstv %s164_s0  ;;  %s113_s0 = smov [#allocation3]  }
   0x2   :  { %v15_v1 = vand.u32 127, %v14_v0  ;;  %v18_v2 = vshrl.u32 %v14_v0, 7  ;;  %s77_s1 = sshll.u32 %s113_s0, 4  ;;  %s78_s1 = int_to_ptr.vmem [resolvable:$true] %s77_s1 }
   0x3   :  { %s91_s13 = scalar_lea.vmem %s78_s1, 512  ;;  %p96_p1 = scmp.lt.s32.totalorder %s78_s1, %s78_s1 }
   0x4   :  { %v24_v3 = vand.u32 3, %v15_v1  ;;  %v26_v4 = vcvt.s32.f32 %v15_v1  ;;  %v38_v5 = vcvt.s32.f32 %v18_v2  ;;  %v48_v7 = vsub.s32 0, %v18_v2  ;;  %p92_p0 = scmp.ne.s32.totalorder %s78_s1, %s91_s13  ;;  %p97_p2 = scmp.lt.s32.totalorder %s91_s13, %s91_s13 }
   0x5   :  { %v16_v9 = vadd.s32 128, %v15_v1  ;;  %v19_v10 = vadd.s32 8, %v18_v2  ;;  %v52_v13 = vsub.s32 1, %v18_v2 }
   0x6   :  { %v29_v11 = vmul.f32 0.0625, %v26_v4  ;;  %v40_v12 = vadd.f32 0.5, %v38_v5  ;;  %v49_v14 = vrot.slane %v44_v6, %v48_v7  ;;  %vm137_vm0 = vcmp.eq.s32.totalorder %v24_v3, 1  ;;  %p98_p3 = por %p97_p2, %p96_p1 }
   0x7   :  { %v25_v15 = vand.u32 3, %v16_v9  ;;  %v27_v16 = vcvt.s32.f32 %v16_v9  ;;  %v39_v20 = vcvt.s32.f32 %v19_v10  ;;  %v53_v23 = vrot.slane %v44_v6, %v52_v13 }
   0x8   :  { %v31_v17 = vfloor.f32 %v29_v11  ;;  %v42_v18 = vmul.f32 %v40_v12, %v35_v8  ;;  %vm141_vm1 = vcmp.eq.s32.totalorder %v24_v3, 0  ;;  %p99_p4 = pnand %p98_p3, %p92_p0 }
   0x9   :  { %v30_v21 = vmul.f32 0.0625, %v27_v16  ;;  %v41_v24 = vadd.f32 0.5, %v39_v20  ;;  %vm147_vm2 = vcmp.eq.s32.totalorder %v25_v15, 1  ;;  %vm57_vm3 = vcmp.eq.s32.totalorder %v25_v15, 0 }
   0xa   :  { %v33_v22 = vadd.f32 0.5, %v31_v17  ;;  %v60_v26 = vsel %vm137_vm0, %v42_v18, %v49_v14  ;;  %v61_v33 = vsel %vm147_vm2, %v42_v18, %v53_v23 }
   0xb   :  { %v32_v27 = vfloor.f32 %v30_v21  ;;  %v43_v30 = vmul.f32 %v41_v24, %v35_v8 }
   0xc   :  { %v36_v29 = vmul.f32 %v35_v8, %v33_v22 }
   0xd   :  { %v34_v31 = vadd.f32 0.5, %v32_v27  ;;  %v62_v34 = vsel %vm137_vm0, %v43_v30, %v49_v14  ;;  %v63_v35 = vsel %vm147_vm2, %v43_v30, %v53_v23 }
   0xe   :  { %v64_v32 = vsel %vm141_vm1, %v36_v29, %v60_v26  ;;  %v66_v37 = vsel %vm141_vm1, %v36_v29, %v62_v34 }
   0xf   :  { %68 = vst [vmem:[#allocation3] sm:$0xff] %v64_v32  ;;  %v37_v36 = vmul.f32 %v35_v8, %v34_v31  ;;  %70 = vst [vmem:[#allocation3 + $0x10] sm:$0xff] %v66_v37 }
  0x11   :  { %v65_v38 = vsel %vm57_vm3, %v37_v36, %v61_v33  ;;  %v67_v39 = vsel %vm57_vm3, %v37_v36, %v63_v35 }
  0x12   :  { %69 = vst [vmem:[#allocation3 + $0x8] sm:$0xff] %v65_v38  ;;  %71 = vst [vmem:[#allocation3 + $0x18] sm:$0xff] %v67_v39 }
  0x13   :  { %102 = shalt.err (!%p99_p4)
}
  0x14   :  { %s114_s14 = smov 256   ;;  %s115_s15 = smov 16  }
  0x15   :  { %83 = dma.vmem_to_hbm [thread:$0]  %s78_s1, 512, %s166_s2, [#allocation4], %s114_s14, %s114_s14, %s115_s15  }
  0x16   :  { %111 = dma.done.wait [#allocation4], 512  }
  0x17   :  { %112 = vsyncadd [#allocation4], 4294966784 }
  0x18   :  { %87 = vsyncpa [#allocation4], 1 }

</bundles_post_ra>
